<compile_context>
chip_gen: v5e
topology: v5e:2x2
jax: 0.10.0
libtpu: 0.0.40
codegen_flags: <defaults>
</compile_context>

<pallas_src>
import jax
import jax.numpy as jnp
from jax.experimental import pallas as pl
from jax.experimental.pallas import tpu as pltpu

LANES = 128                    # vreg lane width
SUBLANES = 8                   # f32 sublane count
ROW_GROUP = LANES * SUBLANES   # 1024 elements = one (8,128) f32 tile


def _round_up(x, m):
    return ((x + m - 1) // m) * m


def _linear_kernel(x_ref, w_ref, b_ref, o_ref):
    # x_ref: (tile_m, 128) VMEM tile; w_ref / b_ref: (1,) f32 in SMEM.
    w = w_ref[0]
    b = b_ref[0]
    o_ref[...] = (x_ref[...].astype(jnp.float32) * w + b).astype(o_ref.dtype)


def _max_tile_m():
    """Per-generation block rows (each row = 128 f32 lanes)."""
    try:
        kind = jax.devices()[0].device_kind.lower()
    except Exception:
        kind = ""
    if "v5" in kind:
        return 4096   # 2 MiB block, 8 MiB double-buffered: fits v5e's 16 MiB default
    return 8192       # v6e / v7x: 4 MiB block, 16 MiB double-buffered in+out


def _choose_tile_m(m_rows, max_tile_m):
    tile = min(max_tile_m, _round_up(m_rows, SUBLANES))
    # Keep >= 2 grid steps when there is enough work (v7x has 2 TensorCores);
    # one extra ~0.35us grid step is negligible on single-TC chips.
    if m_rows >= 2 * SUBLANES:
        tile = min(tile, _round_up(pl.cdiv(m_rows, 2), SUBLANES))
    return max(tile, SUBLANES)


def _run_slab(x_slab, w_s, b_s, out_dtype):
    """Stream a lane-dense (m, 128) slab through the FMA kernel."""
    m = x_slab.shape[0]
    tile_m = _choose_tile_m(m, _max_tile_m())
    grid = (pl.cdiv(m, tile_m),)           # last block may be partial (masked)
    elems = m * LANES
    itemsize = jnp.dtype(x_slab.dtype).itemsize

    return pl.pallas_call(
        _linear_kernel,
        out_shape=jax.ShapeDtypeStruct((m, LANES), out_dtype),
        grid_spec=pltpu.PrefetchScalarGridSpec(
            num_scalar_prefetch=0,
            grid=grid,
            in_specs=[
                pl.BlockSpec((tile_m, LANES), lambda i: (i, 0)),
                pl.BlockSpec(memory_space=pltpu.MemorySpace.SMEM),
                pl.BlockSpec(memory_space=pltpu.MemorySpace.SMEM),
            ],
            out_specs=pl.BlockSpec((tile_m, LANES), lambda i: (i, 0)),
        ),
        compiler_params=pltpu.CompilerParams(
            dimension_semantics=("parallel",),
            vmem_limit_bytes=48 << 20,
        ),
        cost_estimate=pl.CostEstimate(
            flops=2 * elems,
            transcendentals=0,
            bytes_accessed=2 * elems * itemsize,
        ),
    )(x_slab, w_s, b_s)


def linear_regression(x, weight, bias):
    """nn.Linear(1, 1) forward: x (N, 1) -> (N, 1)."""
    n = x.shape[0]
    dtype = x.dtype
    w_s = weight.reshape(1).astype(jnp.float32)
    b_s = bias.reshape(1).astype(jnp.float32)

    if n == 0:
        return jnp.zeros((0, 1), dtype)

    if n % ROW_GROUP == 0:
        # Fast path: reshape is metadata-only; no pad, no output slice.
        slab = x.reshape(n // LANES, LANES)
        return _run_slab(slab, w_s, b_s, dtype).reshape(n, 1)

    n_main = (n // ROW_GROUP) * ROW_GROUP
    if n_main == 0:
        # Tiny input: pad up to one (8, 128) block; copy cost is negligible.
        x_slab = jnp.pad(x.reshape(-1), (0, ROW_GROUP - n)).reshape(SUBLANES, LANES)
        out = _run_slab(x_slab, w_s, b_s, dtype)
        return out.reshape(-1)[:n].reshape(n, 1)

    # Ragged N: kernel handles the 1024-aligned prefix, plain jnp finishes the
    # < 1024-element tail (avoids a full-array pad + full-array slice pass).
    main = x[:n_main].reshape(n_main // LANES, LANES)
    out_main = _run_slab(main, w_s, b_s, dtype).reshape(n_main, 1)
    out_tail = (x[n_main:].astype(jnp.float32) * w_s[0] + b_s[0]).astype(dtype)
    return jnp.concatenate([out_main, out_tail], axis=0)


if __name__ == "__main__":
    key = jax.random.PRNGKey(0)
    kw, kb, k1, k2, k3, k4 = jax.random.split(key, 6)

    # Deterministic parameters mimicking nn.Linear(1, 1).
    weight = jax.random.uniform(kw, (1, 1), jnp.float32, -1.0, 1.0)
    bias = jax.random.uniform(kb, (1,), jnp.float32, -1.0, 1.0)

    def ref(x):
        return x @ weight.T + bias

    # 1) Small batch (tiny path: single padded (8,128) block).
    x1 = jax.random.normal(k1, (8, 1), jnp.float32)
    o1 = jax.block_until_ready(linear_regression(x1, weight, bias))
    assert o1.shape == (8, 1) and jnp.allclose(o1, ref(x1), atol=1e-6)

    # 2) Aligned batch (fast path: no pad, no slice, grid of 2 blocks).
    x2 = jax.random.normal(k2, (2048, 1), jnp.float32)
    o2 = jax.block_until_ready(linear_regression(x2, weight, bias))
    assert o2.shape == (2048, 1) and jnp.allclose(o2, ref(x2), atol=1e-6)

    # 3) Aligned batch with a partial (masked) last block.
    x3 = jax.random.normal(k3, (3072, 1), jnp.float32)
    o3 = jax.block_until_ready(linear_regression(x3, weight, bias))
    assert o3.shape == (3072, 1) and jnp.allclose(o3, ref(x3), atol=1e-6)

    # 4) Ragged batch (kernel on aligned prefix + jnp tail).
    x4 = jax.random.normal(k4, (1030, 1), jnp.float32)
    o4 = jax.block_until_ready(linear_regression(x4, weight, bias))
    assert o4.shape == (1030, 1) and jnp.allclose(o4, ref(x4), atol=1e-6)

    print("KERNEL_OK")
</pallas_src>

<mosaic_0001>
module attributes {stable_mosaic.version = 11 : i64} {
  func.func @_linear_kernel(%arg0: i32, %arg1: memref<8x128xf32, #tpu.memory_space<vmem>>, %arg2: memref<1xf32, #tpu.memory_space<smem>>, %arg3: memref<1xf32, #tpu.memory_space<smem>>, %arg4: memref<8x128xf32, #tpu.memory_space<vmem>>) attributes {dimension_semantics = [#tpu.dimension_semantics<parallel>], iteration_bounds = array<i64: 1>, scalar_prefetch = 0 : i64, scratch_operands = 0 : i64, tpu.core_type = #tpu.core_type<tc>, window_params = [{transform_indices = @transform_0, window_bounds = array<i64: 8, 128>}, {transform_indices = @transform_1, window_bounds = array<i64: 1>}, {transform_indices = @transform_2, window_bounds = array<i64: 1>}, {transform_indices = @transform_3, window_bounds = array<i64: 8, 128>}]} {
    %c0 = arith.constant 0 : index
    %0 = memref.load %arg2[%c0] : memref<1xf32, #tpu.memory_space<smem>>
    %c0_0 = arith.constant 0 : index
    %1 = memref.load %arg3[%c0_0] : memref<1xf32, #tpu.memory_space<smem>>
    %c0_1 = arith.constant 0 : index
    %c0_2 = arith.constant 0 : index
    %2 = vector.load %arg1[%c0_1, %c0_2] : memref<8x128xf32, #tpu.memory_space<vmem>>, vector<8x128xf32>
    %3 = vector.broadcast %0 : f32 to vector<8x128xf32>
    %4 = arith.mulf %2, %3 : vector<8x128xf32>
    %5 = vector.broadcast %1 : f32 to vector<8x128xf32>
    %6 = arith.addf %4, %5 : vector<8x128xf32>
    %c0_3 = arith.constant 0 : index
    %c0_4 = arith.constant 0 : index
    %7 = vector.load %arg4[%c0_3, %c0_4] : memref<8x128xf32, #tpu.memory_space<vmem>>, vector<8x128xf32>
    tpu.vector_store %arg4[%c0_3, %c0_4], %6 {strides = array<i32>} : memref<8x128xf32, #tpu.memory_space<vmem>>, vector<8x128xf32>,
    return
  }
  func.func @transform_0(%arg0: i32) -> (i32, i32) {
    %c0_i32 = arith.constant 0 : i32
    %c0_i32_0 = arith.constant 0 : i32
    return %arg0, %c0_i32 : i32, i32
  }
  func.func @transform_1(%arg0: i32) -> i32 {
    %c0_i32 = arith.constant 0 : i32
    %c0_i32_0 = arith.constant 0 : i32
    return %c0_i32 : i32
  }
  func.func @transform_2(%arg0: i32) -> i32 {
    %c0_i32 = arith.constant 0 : i32
    %c0_i32_0 = arith.constant 0 : i32
    return %c0_i32 : i32
  }
  func.func @transform_3(%arg0: i32) -> (i32, i32) {
    %c0_i32 = arith.constant 0 : i32
    %c0_i32_0 = arith.constant 0 : i32
    return %arg0, %c0_i32 : i32, i32
  }
}

</mosaic_0001>

<bundles_post_ra>
// kernel: tpu_custom_call.1
= control target key start
LH: loop header
LB: loop body
LE: loop exit
PB: predicated region body
PF: predicated region fallthrough
CT: control target
= control target key end

     0   :  { %10 = vsyncpa [#allocation5], 0  ;;  %s144_s0 = inlined_call_operand.hbm [shape: f32[8,128], index: 0, kind: input, shape index: {}]   ;;  %s145_s1 = inlined_call_operand.<no memory space> [shape: f32[1], index: 1, kind: input, shape index: {}]   ;;  %s146_s2 = inlined_call_operand.<no memory space> [shape: f32[1], index: 2, kind: input, shape index: {}]   ;;  %s147_s3 = inlined_call_operand.hbm [shape: f32[8,128], index: 3, kind: output, shape index: {}]  }
   0x1   :  { %11 = vsyncpa [#allocation6], 0  ;;  %s17_s14 = sshll.u32 %s144_s0, 4  ;;  %s110_s15 = smov [#allocation4]   ;;  %s18_s14 = int_to_ptr.hbm [resolvable:$true] %s17_s14 }
   0x2   :  { %s19_s16 = sshll.u32 %s110_s15, 4  ;;  %s20_s16 = int_to_ptr.vmem [resolvable:$true] %s19_s16 }
   0x3   :  { %22 = dma.hbm_to_vmem [thread:$0]  %s18_s14, 128, %s20_s16, [#allocation5]  }
   0x4   :  { %106 = dma.done.wait [#allocation5], 128  }
   0x5   :  { %107 = vsyncadd [#allocation5], 4294967168  ;;  %v34_v0 = vstv %s145_s1  ;;  %v33_v1 = vld [vmem:[#allocation4] sm:$0xff]  ;;  %v36_v2 = vstv %s146_s2  ;;  %s111_s21 = smov [#allocation7]   ;;  %s46_s24 = sshll.u32 %s147_s3, 4  ;;  %s47_s24 = int_to_ptr.hbm [resolvable:$true] %s46_s24 }
   0x6   :  { %s44_s22 = sshll.u32 %s111_s21, 4  ;;  %v35_v3 = vmul.f32 %v34_v0, %v33_v1  ;;  %s45_s22 = int_to_ptr.vmem [resolvable:$true] %s44_s22 }
   0x8   :  { %v37_v4 = vadd.f32 %v36_v2, %v35_v3 }
   0xa   :  { %38 = vst [vmem:[#allocation7] sm:$0xff] %v37_v4 }
   0xb   :  { %49 = dma.vmem_to_hbm [thread:$0]  %s45_s22, 128, %s47_s24, [#allocation6]  }
   0xc   :  { %108 = dma.done.wait [#allocation6], 128  }
   0xd   :  { %109 = vsyncadd [#allocation6], 4294967168 }
   0xe   :  { %54 = vsyncpa [#allocation5], 1 }
   0xf   :  { %55 = vsyncpa [#allocation6], 1 }

</bundles_post_ra>
